<compile_context>
chip_gen: v6e
topology: v6e:2x2x1
jax: 0.10.0
libtpu: 0.0.40
codegen_flags: <defaults>
</compile_context>

<pallas_src>
import jax
import jax.numpy as jnp
from jax import lax
from jax.experimental import pallas as pl
from jax.experimental.pallas import tpu as pltpu


def gemm_bias_relu_kernel(x_ref, w_ref, b_ref, o_ref):
    """Fused (im2col GEMM + bias + ReLU) for one row tile.

    x_ref : (TM, K_pad)   bf16 im2col rows (lane-dense, K padded to 128k)
    w_ref : (K_pad, Cout) bf16 folded conv weights (resident across grid)
    b_ref : (1, Cout)     f32 bias (resident across grid)
    o_ref : (TM, Cout)    output rows (narrow block == full last dim)
    """
    acc = jnp.dot(x_ref[...], w_ref[...], preferred_element_type=jnp.float32)
    acc = jnp.maximum(acc + b_ref[...], 0.0)          # bias + ReLU on f32 VPU
    o_ref[...] = acc.astype(o_ref.dtype)


def conv_relu(x_nchw, weight_oihw, bias, *, row_block=256):
    """3x3 'same' conv (stride 1) + bias + ReLU, NCHW in / NCHW out."""
    N, Cin, H, W = x_nchw.shape
    Cout, _, KH, KW = weight_oihw.shape
    ph, pw = KH // 2, KW // 2                      # 'same' padding, stride 1
    K = KH * KW * Cin
    K_pad = ((K + 127) // 128) * 128               # lane-dense contraction dim
    M = N * H * W                                  # one GEMM row per output pixel
    TM = min(row_block, ((M + 7) // 8) * 8)        # sublane-aligned row tile
    Mp = ((M + TM - 1) // TM) * TM                 # grid-even row count

    # ---- wrapper-side layout plumbing (plain XLA, no in-kernel relayout) ---
    # NCHW -> NHWC, spatial 'same' pad, im2col taps in (kh, kw, cin) order
    # (must match the weight fold below).
    x_nhwc = jnp.transpose(x_nchw, (0, 2, 3, 1))
    x_sp = jnp.pad(x_nhwc, ((0, 0), (ph, ph), (pw, pw), (0, 0)))
    taps = [x_sp[:, kh:kh + H, kw:kw + W, :]
            for kh in range(KH) for kw in range(KW)]
    patches = jnp.concatenate(taps, axis=-1).reshape(M, K)
    patches = jnp.pad(patches, ((0, Mp - M), (0, K_pad - K)))
    patches = patches.astype(jnp.bfloat16)                        # MXU bf16 LHS

    w2d = jnp.transpose(weight_oihw, (2, 3, 1, 0)).reshape(K, Cout)
    w2d = jnp.pad(w2d, ((0, K_pad - K), (0, 0))).astype(jnp.bfloat16)
    b2d = bias.reshape(1, Cout).astype(jnp.float32)

    out = pl.pallas_call(
        gemm_bias_relu_kernel,
        out_shape=jax.ShapeDtypeStruct((Mp, Cout), x_nchw.dtype),
        grid_spec=pltpu.PrefetchScalarGridSpec(
            num_scalar_prefetch=0,
            grid=(Mp // TM,),
            in_specs=[
                # Row tile of im2col rows, streamed (double-buffered) per step.
                pl.BlockSpec((TM, K_pad), lambda i: (i, 0)),
                # Weights / bias: constant block index -> fetched once, resident.
                pl.BlockSpec((K_pad, Cout), lambda i: (0, 0)),
                pl.BlockSpec((1, Cout), lambda i: (0, 0)),
            ],
            out_specs=pl.BlockSpec((TM, Cout), lambda i: (i, 0)),
        ),
        compiler_params=pltpu.CompilerParams(
            # Pure GEMM with no cross-step state: safe to shard the row-tile
            # axis across both v7x TensorCores / megacore halves.
            dimension_semantics=("parallel",)),
    )(patches, w2d, b2d)

    out = out[:M].reshape(N, H, W, Cout)           # drop grid-padding rows
    return jnp.transpose(out, (0, 3, 1, 2))        # back to NCHW


if __name__ == "__main__":
    # ConvReLu(nn.Conv2d(4, 8, 3, padding=1), out_channel=8, activate='relu')
    N, Cin, H, W = 2, 4, 16, 16
    Cout, KH, KW = 8, 3, 3

    key = jax.random.PRNGKey(0)
    kx, kw_, kb = jax.random.split(key, 3)
    x = jax.random.normal(kx, (N, Cin, H, W), dtype=jnp.float32)
    weight = jax.random.normal(kw_, (Cout, Cin, KH, KW), dtype=jnp.float32) * 0.1
    bias = jax.random.normal(kb, (Cout,), dtype=jnp.float32) * 0.1

    out = jax.block_until_ready(conv_relu(x, weight, bias))

    # Pure-JAX reference with the same bf16-rounded operands (f32 accumulate),
    # so the only difference vs the kernel is accumulation order.
    x_r = x.astype(jnp.bfloat16).astype(jnp.float32)
    w_r = weight.astype(jnp.bfloat16).astype(jnp.float32)
    ref = lax.conv_general_dilated(
        x_r, w_r, window_strides=(1, 1), padding="SAME",
        dimension_numbers=("NCHW", "OIHW", "NCHW"))
    ref = jnp.maximum(ref + bias.reshape(1, Cout, 1, 1), 0.0)

    assert out.shape == (N, Cout, H, W)
    assert jnp.allclose(out, ref, atol=1e-3, rtol=1e-3)
    print("KERNEL_OK")
</pallas_src>

<mosaic_0001>
module attributes {stable_mosaic.version = 11 : i64} {
  func.func @gemm_bias_relu_kernel(%arg0: i32, %arg1: memref<256x128xbf16, #tpu.memory_space<vmem>>, %arg2: memref<128x8xbf16, #tpu.memory_space<vmem>>, %arg3: memref<1x8xf32, #tpu.memory_space<vmem>>, %arg4: memref<256x8xf32, #tpu.memory_space<vmem>>) attributes {dimension_semantics = [#tpu.dimension_semantics<parallel>], iteration_bounds = array<i64: 2>, scalar_prefetch = 0 : i64, scratch_operands = 0 : i64, tpu.core_type = #tpu.core_type<tc>, window_params = [{transform_indices = @transform_0, window_bounds = array<i64: 256, 128>}, {pipeline_mode = #tpu.pipeline_mode<synchronous>, transform_indices = @transform_1, window_bounds = array<i64: 128, 8>}, {pipeline_mode = #tpu.pipeline_mode<synchronous>, transform_indices = @transform_2, window_bounds = array<i64: 1, 8>}, {transform_indices = @transform_3, window_bounds = array<i64: 256, 8>}]} {
    %c0 = arith.constant 0 : index
    %c0_0 = arith.constant 0 : index
    %0 = vector.load %arg1[%c0, %c0_0] : memref<256x128xbf16, #tpu.memory_space<vmem>>, vector<256x128xbf16>
    %c0_1 = arith.constant 0 : index
    %c0_2 = arith.constant 0 : index
    %1 = vector.load %arg2[%c0_1, %c0_2] : memref<128x8xbf16, #tpu.memory_space<vmem>>, vector<128x8xbf16>
    %cst = arith.constant dense<0.000000e+00> : vector<256x8xf32>
    %2 = tpu.matmul %0, %1, %cst {dimension_numbers = #tpu.dot_dimension_numbers<[1], [0], [0], [1], [0, 0, 1, 1], [], []>} : vector<256x128xbf16>, vector<128x8xbf16>, vector<256x8xf32> -> vector<256x8xf32>
    %c0_3 = arith.constant 0 : index
    %c0_4 = arith.constant 0 : index
    %3 = vector.load %arg3[%c0_3, %c0_4] : memref<1x8xf32, #tpu.memory_space<vmem>>, vector<1x8xf32>
    %4 = vector.broadcast %3 : vector<1x8xf32> to vector<256x8xf32>
    %5 = arith.addf %2, %4 : vector<256x8xf32>
    %cst_5 = arith.constant 0.000000e+00 : f32
    %6 = vector.broadcast %cst_5 : f32 to vector<256x8xf32>
    %7 = arith.maximumf %5, %6 : vector<256x8xf32>
    %c0_6 = arith.constant 0 : index
    %c0_7 = arith.constant 0 : index
    %8 = vector.load %arg4[%c0_6, %c0_7] : memref<256x8xf32, #tpu.memory_space<vmem>>, vector<256x8xf32>
    tpu.vector_store %arg4[%c0_6, %c0_7], %7 {strides = array<i32>} : memref<256x8xf32, #tpu.memory_space<vmem>>, vector<256x8xf32>,
    return
  }
  func.func @transform_0(%arg0: i32) -> (i32, i32) {
    %c0_i32 = arith.constant 0 : i32
    %c0_i32_0 = arith.constant 0 : i32
    return %arg0, %c0_i32 : i32, i32
  }
  func.func @transform_1(%arg0: i32) -> (i32, i32) {
    %c0_i32 = arith.constant 0 : i32
    %c0_i32_0 = arith.constant 0 : i32
    %c0_i32_1 = arith.constant 0 : i32
    return %c0_i32, %c0_i32_0 : i32, i32
  }
  func.func @transform_2(%arg0: i32) -> (i32, i32) {
    %c0_i32 = arith.constant 0 : i32
    %c0_i32_0 = arith.constant 0 : i32
    %c0_i32_1 = arith.constant 0 : i32
    return %c0_i32, %c0_i32_0 : i32, i32
  }
  func.func @transform_3(%arg0: i32) -> (i32, i32) {
    %c0_i32 = arith.constant 0 : i32
    %c0_i32_0 = arith.constant 0 : i32
    return %arg0, %c0_i32 : i32, i32
  }
}

</mosaic_0001>

<bundles_post_ra>
// kernel: tpu_custom_call.1
= control target key start
LH: loop header
LB: loop body
LE: loop exit
PB: predicated region body
PF: predicated region fallthrough
CT: control target
= control target key end

     0   :  { %8 = vsyncpa [#allocation3], 0  ;;  %s1210_s0 = inlined_call_operand.hbm [shape: bf16[512,128], index: 0, kind: input, shape index: {}]   ;;  %s1211_s1 = inlined_call_operand.vmem [shape: bf16[128,8], index: 1, kind: input, shape index: {}]   ;;  %s1212_s2 = inlined_call_operand.vmem [shape: f32[1,8], index: 2, kind: input, shape index: {}]   ;;  %s1213_s3 = inlined_call_operand.vmem [shape: f32[512,8], index: 3, kind: output, shape index: {}]  }
   0x1   :  { %10 = vsyncpa [#allocation3 + $0x1], 0  ;;  %s965_s12 = smov 0   ;;  %s967_s13 = smov 0  }
   0x2   :  { %s969_s14 = smov 0   ;;  %s971_s15 = smov 0  }
   0x3 LB: > { %s686_s16 = sadd.s32 4294967295, %s940_s15   ;;  %s985_s17 = sadd.s32 1, %s940_s15   ;;  %s940_s15 = sphi %s971_s15, %s1222_s15   ;;  %s936_s14 = sphi %s969_s14, %s1221_s14   ;;  %s932_s13 = sphi %s967_s13, %s1220_s13   ;;  %s928_s12 = sphi %s965_s12, %s1219_s12  }
   0x4   : > { %s20_s18 = ssub.s32 %s940_s15, %s985_s17  ;;  %s23_s19 = sadd.s32 1, %s936_s14 }
   0x5   : > { %p21_p0 = scmp.eq.s32.totalorder %s20_s18, 0  ;;  %p30_p1 = scmp.ne.s32.totalorder %s936_s14, %s932_s13 }
   0x6   : > { %p31_p2 = scmp.eq.s32.totalorder %s940_s15, 0  ;;  %p36_p3 = scmp.ne.s32.totalorder %s932_s13, %s928_s12 }
   0x7   : > { %s995_s20 = scalar_select %p21_p0, %s936_s14, %s23_s19  }
   0x8   : > { %p32_p4 = por %p31_p2, %p30_p1  ;;  %p37_p5 = scmp.eq.s32.totalorder %s686_s16, 0 }
   0x9   : > { %p819_p6 = scmp.lt.s32.totalorder %s940_s15, 2  ;;  %s134_s22 = sand.u32 1, %s936_s14  }
   0xa   : > { %p1000_p7 = por %p37_p5, %p36_p3  ;;  %s690_s23 = sshll.u32 %s134_s22, 7 }
   0xb   : > { %s724_s24 = sshll.u32 %s940_s15, 11  ;;  %s138_s28 = scalar_lea.vmem [#allocation2], %s690_s23 }
   0xc   : > { %s1215_s21 = scalar_select %p1000_p7, 1, 0 }
   0xd   : > { %s1009_s27 = scalar_lea.hbm %s1210_s0, %s724_s24  ;;  %s145_s29 = sshll.u32 %s138_s28, 4  ;;  %s1011_s29 = int_to_ptr.vmem [resolvable:$true] %s145_s29 }
   0xe   : > { %p1013_p8 = pnand %p819_p6, %p32_p4  ;;  %s1018_s4 = scalar_lea.sflag [#allocation3], %s134_s22 }
   0xf   : > { %s878_s5 = scalar_lea.hbm %s1009_s27, 2048  ;;  %s883_s8 = scalar_lea.hbm %s1210_s0, 4096 }
  0x10   : > { %p879_p10 = scmp.ne.s32.totalorder %s1009_s27, %s878_s5  ;;  %p880_p11 = pneg %p1013_p8 }
  0x11   : > { %p884_p0 = scmp.lt.s32.totalorder %s1009_s27, %s1210_s0  ;;  %p885_p1 = scmp.lt.s32.totalorder %s883_s8, %s878_s5 }
  0x12   : > { %p881_p12 = pnand %p880_p11, %p879_p10 }
  0x13   : > { %p886_p2 = por %p885_p1, %p884_p0 }
  0x14   : > { %p882_p13 = pneg %p881_p12 }
  0x16   : > { %p887_p3 = pnand %p886_p2, %p882_p13 }
  0x18   : > { %890 = shalt.err (!%p887_p3)
}
  0x19   : > { %s891_s11 = scalar_lea.vmem %s1011_s29, 2048  ;;  %s942_s12 = smov [#allocation2]  }
  0x1a   : > { %p892_p4 = scmp.ne.s32.totalorder %s1011_s29, %s891_s11  ;;  %s896_s18 = sshll.u32 %s942_s12, 4  ;;  %s897_s18 = int_to_ptr.vmem [resolvable:$false] %s896_s18 }
  0x1b   : > { %s898_s19 = scalar_lea.vmem %s897_s18, 4096  ;;  %p899_p10 = scmp.lt.s32.totalorder %s1011_s29, %s897_s18 }
  0x1c   : > { %p894_p5 = pnand %p892_p4, %p880_p11  ;;  %p900_p12 = scmp.lt.s32.totalorder %s898_s19, %s891_s11 }
  0x1e   : > { %p895_p6 = pneg %p894_p5  ;;  %p901_p9 = por %p900_p12, %p899_p10 }
  0x20   : > { %p902_p7 = pnand %p901_p9, %p895_p6 }
  0x22   : > { %905 = shalt.err (!%p902_p7)
}
  0x23   : > { %s943_s22 = smov 64   ;;  %s944_s23 = smov 4  }
  0x24   : > { %818 = dma.hbm_to_vmem [thread:$0]  (!%p1013_p8), %s1009_s27, 2048, %s1011_s29, %s1018_s4, %s943_s22, %s943_s22, %s944_s23  }
  0x25   : > { %p153_p11 = scmp.lt.s32.totalorder %s940_s15, 3  ;;  %p1217_p13 = scmp.ge.s32.totalorder %s940_s15, 1 }
  0x27   : > { %p154_p0 = pnand %p1217_p13, %p153_p11 }
  0x28   : > { %s159_s24 = sand.u32 (!%p154_p0), 1, %s932_s13   ;;  %p1218_p7 = scmp.ne.s32.totalorder (!%p154_p0), %s1215_s21, 0 }
  0x29   : > { %157 = sbr.rel (%p154_p0) target bundleno = 308 (0x134), region = 32  ;;  %s694_s25 = sshll.u32 (!%p154_p0), %s159_s24, 7 }
  0x2a   : > { %s160_s26 = scalar_lea.sflag (!%p154_p0), [#allocation3], %s159_s24  ;;  %s1043_s28 = scalar_lea.vmem (!%p154_p0), [#allocation2], %s694_s25 }
  0x2e   : > { %923 = dma.done.wait (%p1218_p7), %s160_s26, 2048  }
  0x2f   : > { %925 = vsyncadd (%p1218_p7), %s160_s26, 4294965248  ;;  %v854_v0 = vld [vmem:[%s1211_s1 + $0x38] sm:$0xff]   ;;  %v855_v1 = vld [vmem:[%s1211_s1 + $0x30] sm:$0xff]   ;;  %s695_s23 = sshll.u32 %s686_s16, 5  ;;  %vm586_vm0 = vcmask 64512  }
  0x30   : > { %749 = vmatprep.subr.bf16.mxu0 %v854_v0  ;;  %797 = vmatprep.subr.bf16.mxu1 %v854_v0  ;;  %v856_v2 = vld [vmem:[%s1211_s1 + $0x28] sm:$0xff]   ;;  %v857_v3 = vld [vmem:[%s1211_s1 + $0x20] sm:$0xff]   ;;  %v858_v6 = vld [vmem:[%s1211_s1 + $0x18] sm:$0xff]   ;;  %p188_p8 = scmp.lt.s32.totalorder %s695_s23, 63 }
  0x31   : > { %750 = vmatpush3.bf16.msra.mxu0 %v854_v0  ;;  %805 = vmatpush3.bf16.msra.mxu1 %v854_v0  ;;  %v862_v4 = vld [vmem:[%s1043_s28] sm:$0xff]   ;;  %v859_v7 = vld [vmem:[%s1211_s1 + $0x10] sm:$0xff]   ;;  %v860_v8 = vld [vmem:[%s1211_s1 + $0x8] sm:$0xff]  }
  0x32   : > { %751 = vmatprep.subr.bf16.mxu0 %v855_v1  ;;  %798 = vmatprep.subr.bf16.mxu1 %v855_v1  ;;  %v863_v5 = vld [vmem:[%s1043_s28 + $0x40] sm:$0xff]   ;;  %v864_v10 = vld [vmem:[%s1043_s28 + $0x8] sm:$0xff]   ;;  %v866_v12 = vld [vmem:[%s1043_s28 + $0x10] sm:$0xff]   ;;  %s1224_s23 = smov (!%p188_p8, %s695_s23), 63 }
  0x33   : > { %765 = vmatprep.mubr.bf16.mxu0 %v862_v4  ;;  %781 = vmatprep.mubr.bf16.mxu1 %v863_v5  ;;  %v861_v9 = vld [vmem:[%s1211_s1] sm:$0xff]   ;;  %v865_v11 = vld [vmem:[%s1043_s28 + $0x48] sm:$0xff]   ;;  %v867_v13 = vld [vmem:[%s1043_s28 + $0x50] sm:$0xff]   ;;  %s696_s26 = sshll.u32 %s1224_s23, 3 }
  0x34   : > { %v868_v14 = vld [vmem:[%s1043_s28 + $0x18] sm:$0xff]   ;;  %v870_v16 = vld [vmem:[%s1043_s28 + $0x20] sm:$0xff]   ;;  %v872_v18 = vld [vmem:[%s1043_s28 + $0x28] sm:$0xff]   ;;  %s1101_s6 = scalar_lea.vmem %s1213_s3, %s696_s26 }
  0x35   : > { %752 = vmatpush3.bf16.msra.mxu0 %v855_v1  ;;  %806 = vmatpush3.bf16.msra.mxu1 %v855_v1  ;;  %v869_v15 = vld [vmem:[%s1043_s28 + $0x58] sm:$0xff]   ;;  %v871_v17 = vld [vmem:[%s1043_s28 + $0x60] sm:$0xff]   ;;  %v873_v19 = vld [vmem:[%s1043_s28 + $0x68] sm:$0xff]  }
  0x36   : > { %753 = vmatprep.subr.bf16.mxu0 %v856_v2  ;;  %799 = vmatprep.subr.bf16.mxu1 %v856_v2  ;;  %v874_v20 = vld [vmem:[%s1043_s28 + $0x30] sm:$0xff]   ;;  %v876_v22 = vld [vmem:[%s1043_s28 + $0x38] sm:$0xff]   ;;  %v1094_v24 = vld [vmem:[%s1212_s2] ss:$0 sm:$0xff] }
  0x37   : > { %v875_v21 = vld [vmem:[%s1043_s28 + $0x70] sm:$0xff]   ;;  %v877_v23 = vld [vmem:[%s1043_s28 + $0x78] sm:$0xff]  }
  0x39   : > { %754 = vmatpush3.bf16.msra.mxu0 %v856_v2  ;;  %807 = vmatpush3.bf16.msra.mxu1 %v856_v2 }
  0x3a   : > { %755 = vmatprep.subr.bf16.mxu0 %v857_v3  ;;  %800 = vmatprep.subr.bf16.mxu1 %v857_v3 }
  0x3d   : > { %756 = vmatpush3.bf16.msra.mxu0 %v857_v3  ;;  %808 = vmatpush3.bf16.msra.mxu1 %v857_v3 }
  0x3e   : > { %757 = vmatprep.subr.bf16.mxu0 %v858_v6  ;;  %801 = vmatprep.subr.bf16.mxu1 %v858_v6 }
  0x41   : > { %758 = vmatpush3.bf16.msra.mxu0 %v858_v6  ;;  %809 = vmatpush3.bf16.msra.mxu1 %v858_v6 }
  0x42   : > { %759 = vmatprep.subr.bf16.mxu0 %v859_v7  ;;  %802 = vmatprep.subr.bf16.mxu1 %v859_v7 }
  0x45   : > { %760 = vmatpush3.bf16.msra.mxu0 %v859_v7  ;;  %810 = vmatpush3.bf16.msra.mxu1 %v859_v7 }
  0x46   : > { %761 = vmatprep.subr.bf16.mxu0 %v860_v8  ;;  %803 = vmatprep.subr.bf16.mxu1 %v860_v8 }
  0x49   : > { %762 = vmatpush3.bf16.msra.mxu0 %v860_v8  ;;  %811 = vmatpush3.bf16.msra.mxu1 %v860_v8 }
  0x4a   : > { %763 = vmatprep.subr.bf16.mxu0 %v861_v9  ;;  %804 = vmatprep.subr.bf16.mxu1 %v861_v9 }
  0x4d   : > { %764 = vmatpush3.bf16.msra.mxu0 %v861_v9  ;;  %812 = vmatpush3.bf16.msra.mxu1 %v861_v9 }
  0x50   : > { %766 = vmatmul.mubr.bf16.vlgmr.msra.gmra.mxu0 %v864_v10  ;;  %782 = vmatmul.mubr.bf16.vlgmr.msra.gmra.mxu1 %v865_v11 }
  0x51   : > { %769 = vmatprep.mubr.bf16.mxu0 %v866_v12  ;;  %785 = vmatprep.mubr.bf16.mxu1 %v867_v13 }
  0x58   : > { %770 = vmatmul.mubr.bf16.gmra.mxu0 %v868_v14  ;;  %786 = vmatmul.mubr.bf16.gmra.mxu1 %v869_v15 }
  0x59   : > { %773 = vmatprep.mubr.bf16.mxu0 %v870_v16  ;;  %789 = vmatprep.mubr.bf16.mxu1 %v871_v17 }
  0x60   : > { %774 = vmatmul.mubr.bf16.gmra.mxu0 %v872_v18  ;;  %790 = vmatmul.mubr.bf16.gmra.mxu1 %v873_v19 }
  0x61   : > { %777 = vmatprep.mubr.bf16.mxu0 %v874_v20  ;;  %793 = vmatprep.mubr.bf16.mxu1 %v875_v21 }
  0x68   : > { %778 = vmatmul.mubr.bf16.gmra.mxu0 %v876_v22  ;;  %794 = vmatmul.mubr.bf16.gmra.mxu1 %v877_v23 }
 0x110   : > { %v767_v25 = vpop.f32.mrf.mxu0  ;;  %v783_v26 = vpop.f32.mrf.mxu1 }
 0x111   : > { %v436_v27 = vadd.f32 %v767_v25, %v1094_v24  ;;  %v500_v28 = vadd.f32 %v783_v26, %v1094_v24 }
 0x112   : > { %v427_v29 = vpop.f32.mrf.mxu0  ;;  %v491_v30 = vpop.f32.mrf.mxu1 }
 0x113   : > { %v556_v31 = vmax.f32 %v436_v27, 0.0  ;;  %v572_v32 = vmax.f32 %v500_v28, 0.0  ;;  %v428_v33 = vadd.f32 %v1094_v24, %v427_v29  ;;  %v492_v34 = vadd.f32 %v1094_v24, %v491_v30 }
 0x114   : > { %v768_v35 = vpop.f32.mrf.mxu0  ;;  %v784_v36 = vpop.f32.mrf.mxu1 }
 0x115   : > { %589 = vst.msk [vmem:[%s1101_s6 + $0x10] sm:$0xff] %vm586_vm0, %v556_v31  ;;  %605 = vst.msk [vmem:[%s1101_s6 + $0x90] sm:$0xff] %vm586_vm0, %v572_v32  ;;  %v554_v37 = vmax.f32 %v428_v33, 0.0  ;;  %v570_v38 = vmax.f32 %v492_v34, 0.0  ;;  %v439_v39 = vadd.f32 %v768_v35, %v1094_v24  ;;  %v503_v40 = vadd.f32 %v784_v36, %v1094_v24 }
 0x116   : > { %v430_v41 = vpop.f32.mrf.mxu0  ;;  %v494_v42 = vpop.f32.mrf.mxu1 }
 0x117   : > { %587 = vst.msk [vmem:[%s1101_s6] sm:$0xff] %vm586_vm0, %v554_v37  ;;  %603 = vst.msk [vmem:[%s1101_s6 + $0x80] sm:$0xff] %vm586_vm0, %v570_v38  ;;  %v557_v43 = vmax.f32 %v439_v39, 0.0  ;;  %v573_v44 = vmax.f32 %v503_v40, 0.0  ;;  %v431_v45 = vadd.f32 %v1094_v24, %v430_v41  ;;  %v495_v46 = vadd.f32 %v1094_v24, %v494_v42 }
 0x118   : > { %v771_v47 = vpop.f32.mrf.mxu0  ;;  %v787_v48 = vpop.f32.mrf.mxu1 }
 0x119   : > { %590 = vst.msk [vmem:[%s1101_s6 + $0x18] sm:$0xff] %vm586_vm0, %v557_v43  ;;  %606 = vst.msk [vmem:[%s1101_s6 + $0x98] sm:$0xff] %vm586_vm0, %v573_v44  ;;  %v555_v49 = vmax.f32 %v431_v45, 0.0  ;;  %v571_v50 = vmax.f32 %v495_v46, 0.0  ;;  %v452_v51 = vadd.f32 %v771_v47, %v1094_v24  ;;  %v516_v52 = vadd.f32 %v787_v48, %v1094_v24 }
 0x11a   : > { %v443_v53 = vpop.f32.mrf.mxu0  ;;  %v507_v54 = vpop.f32.mrf.mxu1 }
 0x11b   : > { %588 = vst.msk [vmem:[%s1101_s6 + $0x8] sm:$0xff] %vm586_vm0, %v555_v49  ;;  %604 = vst.msk [vmem:[%s1101_s6 + $0x88] sm:$0xff] %vm586_vm0, %v571_v50  ;;  %v560_v55 = vmax.f32 %v452_v51, 0.0  ;;  %v576_v56 = vmax.f32 %v516_v52, 0.0  ;;  %v444_v57 = vadd.f32 %v1094_v24, %v443_v53  ;;  %v508_v58 = vadd.f32 %v1094_v24, %v507_v54 }
 0x11c   : > { %v772_v59 = vpop.f32.mrf.mxu0  ;;  %v788_v60 = vpop.f32.mrf.mxu1 }
 0x11d   : > { %593 = vst.msk [vmem:[%s1101_s6 + $0x30] sm:$0xff] %vm586_vm0, %v560_v55  ;;  %609 = vst.msk [vmem:[%s1101_s6 + $0xb0] sm:$0xff] %vm586_vm0, %v576_v56  ;;  %v558_v61 = vmax.f32 %v444_v57, 0.0  ;;  %v574_v62 = vmax.f32 %v508_v58, 0.0  ;;  %v455_v63 = vadd.f32 %v772_v59, %v1094_v24  ;;  %v519_v0 = vadd.f32 %v788_v60, %v1094_v24 }
 0x11e   : > { %v446_v1 = vpop.f32.mrf.mxu0  ;;  %v510_v2 = vpop.f32.mrf.mxu1 }
 0x11f   : > { %591 = vst.msk [vmem:[%s1101_s6 + $0x20] sm:$0xff] %vm586_vm0, %v558_v61  ;;  %607 = vst.msk [vmem:[%s1101_s6 + $0xa0] sm:$0xff] %vm586_vm0, %v574_v62  ;;  %v561_v3 = vmax.f32 %v455_v63, 0.0  ;;  %v577_v4 = vmax.f32 %v519_v0, 0.0  ;;  %v447_v5 = vadd.f32 %v1094_v24, %v446_v1  ;;  %v511_v6 = vadd.f32 %v1094_v24, %v510_v2 }
 0x120   : > { %v775_v7 = vpop.f32.mrf.mxu0  ;;  %v791_v8 = vpop.f32.mrf.mxu1 }
 0x121   : > { %594 = vst.msk [vmem:[%s1101_s6 + $0x38] sm:$0xff] %vm586_vm0, %v561_v3  ;;  %610 = vst.msk [vmem:[%s1101_s6 + $0xb8] sm:$0xff] %vm586_vm0, %v577_v4  ;;  %v559_v9 = vmax.f32 %v447_v5, 0.0  ;;  %v575_v10 = vmax.f32 %v511_v6, 0.0  ;;  %v468_v11 = vadd.f32 %v775_v7, %v1094_v24  ;;  %v532_v12 = vadd.f32 %v791_v8, %v1094_v24 }
 0x122   : > { %v459_v13 = vpop.f32.mrf.mxu0  ;;  %v523_v14 = vpop.f32.mrf.mxu1 }
 0x123   : > { %592 = vst.msk [vmem:[%s1101_s6 + $0x28] sm:$0xff] %vm586_vm0, %v559_v9  ;;  %608 = vst.msk [vmem:[%s1101_s6 + $0xa8] sm:$0xff] %vm586_vm0, %v575_v10  ;;  %v564_v15 = vmax.f32 %v468_v11, 0.0  ;;  %v580_v16 = vmax.f32 %v532_v12, 0.0  ;;  %v460_v17 = vadd.f32 %v1094_v24, %v459_v13  ;;  %v524_v18 = vadd.f32 %v1094_v24, %v523_v14 }
 0x124   : > { %v776_v19 = vpop.f32.mrf.mxu0  ;;  %v792_v20 = vpop.f32.mrf.mxu1 }
 0x125   : > { %597 = vst.msk [vmem:[%s1101_s6 + $0x50] sm:$0xff] %vm586_vm0, %v564_v15  ;;  %613 = vst.msk [vmem:[%s1101_s6 + $0xd0] sm:$0xff] %vm586_vm0, %v580_v16  ;;  %v562_v21 = vmax.f32 %v460_v17, 0.0  ;;  %v578_v22 = vmax.f32 %v524_v18, 0.0  ;;  %v471_v23 = vadd.f32 %v776_v19, %v1094_v24  ;;  %v535_v25 = vadd.f32 %v792_v20, %v1094_v24 }
 0x126   : > { %v462_v26 = vpop.f32.mrf.mxu0  ;;  %v526_v27 = vpop.f32.mrf.mxu1 }
 0x127   : > { %595 = vst.msk [vmem:[%s1101_s6 + $0x40] sm:$0xff] %vm586_vm0, %v562_v21  ;;  %611 = vst.msk [vmem:[%s1101_s6 + $0xc0] sm:$0xff] %vm586_vm0, %v578_v22  ;;  %v565_v28 = vmax.f32 %v471_v23, 0.0  ;;  %v581_v29 = vmax.f32 %v535_v25, 0.0  ;;  %v463_v30 = vadd.f32 %v1094_v24, %v462_v26  ;;  %v527_v31 = vadd.f32 %v1094_v24, %v526_v27 }
 0x128   : > { %v779_v32 = vpop.f32.mrf.mxu0  ;;  %v795_v33 = vpop.f32.mrf.mxu1 }
 0x129   : > { %598 = vst.msk [vmem:[%s1101_s6 + $0x58] sm:$0xff] %vm586_vm0, %v565_v28  ;;  %614 = vst.msk [vmem:[%s1101_s6 + $0xd8] sm:$0xff] %vm586_vm0, %v581_v29  ;;  %v563_v34 = vmax.f32 %v463_v30, 0.0  ;;  %v579_v35 = vmax.f32 %v527_v31, 0.0  ;;  %v484_v36 = vadd.f32 %v779_v32, %v1094_v24  ;;  %v548_v37 = vadd.f32 %v795_v33, %v1094_v24 }
 0x12a   : > { %v475_v38 = vpop.f32.mrf.mxu0  ;;  %v539_v39 = vpop.f32.mrf.mxu1 }
 0x12b   : > { %596 = vst.msk [vmem:[%s1101_s6 + $0x48] sm:$0xff] %vm586_vm0, %v563_v34  ;;  %612 = vst.msk [vmem:[%s1101_s6 + $0xc8] sm:$0xff] %vm586_vm0, %v579_v35  ;;  %v568_v40 = vmax.f32 %v484_v36, 0.0  ;;  %v584_v41 = vmax.f32 %v548_v37, 0.0  ;;  %v476_v42 = vadd.f32 %v1094_v24, %v475_v38  ;;  %v540_v43 = vadd.f32 %v1094_v24, %v539_v39 }
 0x12c   : > { %v780_v44 = vpop.f32.mrf.mxu0  ;;  %v796_v45 = vpop.f32.mrf.mxu1 }
 0x12d   : > { %601 = vst.msk [vmem:[%s1101_s6 + $0x70] sm:$0xff] %vm586_vm0, %v568_v40  ;;  %617 = vst.msk [vmem:[%s1101_s6 + $0xf0] sm:$0xff] %vm586_vm0, %v584_v41  ;;  %v566_v46 = vmax.f32 %v476_v42, 0.0  ;;  %v582_v47 = vmax.f32 %v540_v43, 0.0  ;;  %v487_v48 = vadd.f32 %v780_v44, %v1094_v24  ;;  %v551_v49 = vadd.f32 %v796_v45, %v1094_v24 }
 0x12e   : > { %v478_v50 = vpop.f32.mrf.mxu0  ;;  %v542_v51 = vpop.f32.mrf.mxu1 }
 0x12f   : > { %599 = vst.msk [vmem:[%s1101_s6 + $0x60] sm:$0xff] %vm586_vm0, %v566_v46  ;;  %615 = vst.msk [vmem:[%s1101_s6 + $0xe0] sm:$0xff] %vm586_vm0, %v582_v47  ;;  %v569_v52 = vmax.f32 %v487_v48, 0.0  ;;  %v585_v53 = vmax.f32 %v551_v49, 0.0  ;;  %v479_v54 = vadd.f32 %v1094_v24, %v478_v50  ;;  %v543_v55 = vadd.f32 %v1094_v24, %v542_v51 }
 0x131   : > { %602 = vst.msk [vmem:[%s1101_s6 + $0x78] sm:$0xff] %vm586_vm0, %v569_v52  ;;  %618 = vst.msk [vmem:[%s1101_s6 + $0xf8] sm:$0xff] %vm586_vm0, %v585_v53  ;;  %v567_v56 = vmax.f32 %v479_v54, 0.0  ;;  %v583_v57 = vmax.f32 %v543_v55, 0.0 }
 0x133   : > { %600 = vst.msk [vmem:[%s1101_s6 + $0x68] sm:$0xff] %vm586_vm0, %v567_v56  ;;  %616 = vst.msk [vmem:[%s1101_s6 + $0xe8] sm:$0xff] %vm586_vm0, %v583_v57 }
 0x134 PF: > { %p13_p9 = scmp.ge.s32.totalorder %s985_s17, 4   ;;  %s1219_s12 = smov %s932_s13 }
 0x135   : > { %s1220_s13 = smov %s936_s14  ;;  %s1221_s14 = smov %s995_s20 }
 0x136   : > { %s1222_s15 = smov %s985_s17  ;;  %15 = sbr.rel (!%p13_p9) target bundleno = 3 (0x3), region = 72 }
 0x13b   :  { %641 = vsyncpa [#allocation3], 1 }
 0x13c   :  { %643 = vsyncpa [#allocation3 + $0x1], 1 }

</bundles_post_ra>
